<compile_context>
chip_gen: v5e
topology: v5e:2x2
jax: 0.10.0
libtpu: 0.0.40
codegen_flags: <defaults>
</compile_context>

<pallas_src>
import functools

import jax
import jax.numpy as jnp
from jax import lax
from jax.experimental import pallas as pl
from jax.experimental.pallas import tpu as pltpu
import numpy as np

# ---------------- hyper-parameters (from args) ----------------
N_CLS = 8
FEAT_DIM = 128
BATCH = 16
PROTO_M = 0.95
TEMPERATURE = 0.1
BASE_TEMPERATURE = 0.1


def _disloss_kernel(rounds_ref, valid_ref, gathered_ref, proto_ref,
                    loss_ref, proto_out_ref):
    # ---- 1) prototypes: exactly one vreg (8 x 128 f32), register-carried ----
    proto0 = proto_ref[...]                         # (N_CLS, FEAT_DIM)
    n_rounds = rounds_ref[0]                        # dynamic trip count (SMEM)

    # ---- 2) EMA update, serial only over per-class occurrence rounds.
    #         Round t applies the t-th occurrence of EVERY class at once:
    #         classes are independent, so this is exactly equivalent to the
    #         original per-sample sequential update. ----
    def round_body(t, proto):
        feat_s = gathered_ref[t]                    # (N_CLS, FEAT_DIM), pre-scaled by (1-m)
        v = valid_ref[t]                            # (N_CLS, 1): 1.0 where class has a sample
        cand = proto * PROTO_M + feat_s             # one vmul + one vadd
        nrm2 = jnp.sum(cand * cand, axis=1, keepdims=True)   # XLU lane-reduce
        # rsqrt(max(n2, 1e-24)) == 1 / max(||v||, 1e-12)  (F.normalize eps semantics).
        inv = lax.rsqrt(jnp.maximum(nrm2, 1e-24))             # EUP slot
        return jnp.where(v > 0.0, cand * inv, proto)          # sublane row select

    proto = lax.fori_loop(0, n_rounds, round_body, proto0)
    proto_out_ref[...] = proto                      # single store after the loop

    # ---- 3) dispersion loss over prototypes (single MXU matmul tail) ----
    logits = lax.dot_general(
        proto, proto,
        dimension_numbers=(((1,), (1,)), ((), ())),            # proto @ proto.T
        preferred_element_type=jnp.float32,
    ) * (1.0 / TEMPERATURE)                                    # (N_CLS, N_CLS)

    r_i = lax.broadcasted_iota(jnp.int32, (N_CLS, N_CLS), 0)
    c_i = lax.broadcasted_iota(jnp.int32, (N_CLS, N_CLS), 1)
    offdiag = r_i != c_i                                       # (1-eye)*logits_mask

    neg_sum = jnp.sum(jnp.where(offdiag, jnp.exp(logits), 0.0),
                      axis=1, keepdims=True)                   # (N_CLS, 1)
    # mask.sum(1) == N_CLS - 1 is a compile-time constant.
    mean_prob_neg = jnp.log(neg_sum * (1.0 / (N_CLS - 1)))     # (N_CLS, 1)

    # drop NaN entries (mean over valid rows), matching mean_prob_neg[~isnan]
    valid_rows = jnp.logical_not(jnp.isnan(mean_prob_neg))
    cnt = jnp.sum(valid_rows.astype(jnp.float32))
    tot = jnp.sum(jnp.where(valid_rows, mean_prob_neg, 0.0))
    loss_ref[0, 0] = (TEMPERATURE / BASE_TEMPERATURE) * (tot / cnt)


@functools.partial(jax.jit, donate_argnums=(2,))
def disloss(features, labels, prototypes):
    """Returns (loss, updated_prototypes). `prototypes` is donated (updated in place)."""
    b = features.shape[0]

    # ---- wrapper preprocessing: regroup samples into per-class occurrence
    #      rounds.  gathered[t, c, :] = (1-m) * feature of the t-th sample of
    #      class c; valid[t, c] = 1 iff that slot is populated. ----
    one_hot = (labels[:, None] == jnp.arange(N_CLS, dtype=labels.dtype)[None, :]
               ).astype(jnp.int32)                             # (B, N_CLS)
    cum = jnp.cumsum(one_hot, axis=0)                          # inclusive counts
    t_idx = jnp.take_along_axis(cum, labels[:, None], axis=1)[:, 0] - 1   # (B,)
    counts = jnp.sum(one_hot, axis=0)                          # (N_CLS,)
    n_rounds = jnp.max(counts).astype(jnp.int32).reshape(1)    # (1,) dynamic R

    scaled = features.astype(jnp.float32) * (1.0 - PROTO_M)    # hoisted (1-m) scaling
    gathered = jnp.zeros((b, N_CLS, FEAT_DIM), jnp.float32).at[t_idx, labels].set(scaled)
    valid = jnp.zeros((b, N_CLS), jnp.float32).at[t_idx, labels].set(1.0)[..., None]

    loss, new_proto = pl.pallas_call(
        _disloss_kernel,
        out_shape=(
            jax.ShapeDtypeStruct((1, 1), jnp.float32),
            jax.ShapeDtypeStruct((N_CLS, FEAT_DIM), jnp.float32),
        ),
        in_specs=[
            pl.BlockSpec(memory_space=pltpu.MemorySpace.SMEM),   # n_rounds
            pl.BlockSpec(memory_space=pltpu.MemorySpace.VMEM),   # valid mask per round
            pl.BlockSpec(memory_space=pltpu.MemorySpace.VMEM),   # gathered scaled feats
            pl.BlockSpec(memory_space=pltpu.MemorySpace.VMEM),   # prototypes
        ],
        out_specs=(
            pl.BlockSpec(memory_space=pltpu.MemorySpace.SMEM),   # loss scalar
            pl.BlockSpec(memory_space=pltpu.MemorySpace.VMEM),   # updated prototypes
        ),
        input_output_aliases={3: 1},   # prototypes in -> updated prototypes out
    )(n_rounds, valid, gathered, prototypes)
    return loss[0, 0], new_proto


def _numpy_reference(features, labels, prototypes):
    proto = np.array(prototypes, dtype=np.float64)
    feats = np.array(features, dtype=np.float64)
    lbl = np.array(labels)
    for j in range(feats.shape[0]):
        cidx = int(lbl[j])
        v = proto[cidx] * PROTO_M + feats[j] * (1.0 - PROTO_M)
        v = v / max(np.linalg.norm(v), 1e-12)
        proto[cidx] = v
    logits = proto @ proto.T / TEMPERATURE
    mask = 1.0 - np.eye(N_CLS)
    mp = np.log((mask * np.exp(logits)).sum(1) / mask.sum(1))
    mp = mp[~np.isnan(mp)]
    loss = (TEMPERATURE / BASE_TEMPERATURE) * mp.mean()
    return loss, proto.astype(np.float32)


if __name__ == "__main__":
    key = jax.random.PRNGKey(0)
    k1, k2, k3 = jax.random.split(key, 3)

    # Deterministic synthetic state: prototypes (as produced by init_class_prototypes)
    # are L2-normalized rows; features are L2-normalized encoder outputs.
    proto0 = jax.random.normal(k1, (N_CLS, FEAT_DIM), dtype=jnp.float32)
    proto0 = proto0 / jnp.linalg.norm(proto0, axis=1, keepdims=True)

    features = jax.random.normal(k2, (BATCH, FEAT_DIM), dtype=jnp.float32)
    features = features / jnp.linalg.norm(features, axis=1, keepdims=True)

    labels = jax.random.randint(k3, (BATCH,), 0, N_CLS, dtype=jnp.int32)

    # Snapshot to host BEFORE the call: `prototypes` is donated to the kernel.
    feats_np = np.asarray(features)
    labels_np = np.asarray(labels)
    proto_np = np.asarray(proto0)

    loss, new_proto = disloss(features, labels, proto0)
    jax.block_until_ready((loss, new_proto))

    ref_loss, ref_proto = _numpy_reference(feats_np, labels_np, proto_np)
    if not np.allclose(float(loss), ref_loss, rtol=1e-4, atol=1e-4):
        raise AssertionError(f"loss mismatch: kernel={float(loss)} ref={ref_loss}")
    if not np.allclose(np.asarray(new_proto), ref_proto, rtol=1e-4, atol=1e-4):
        raise AssertionError("prototype mismatch")

    print("KERNEL_OK")
</pallas_src>

<mosaic_0001>
module attributes {stable_mosaic.version = 11 : i64} {
  func.func @_disloss_kernel(%arg0: memref<1xi32, #tpu.memory_space<smem>>, %arg1: memref<16x8x1xf32, #tpu.memory_space<vmem>>, %arg2: memref<16x8x128xf32, #tpu.memory_space<vmem>>, %arg3: memref<8x128xf32, #tpu.memory_space<vmem>>, %arg4: memref<1x1xf32, #tpu.memory_space<smem>>, %arg5: memref<8x128xf32, #tpu.memory_space<vmem>>) attributes {dimension_semantics = [], scalar_prefetch = 0 : i64, scratch_operands = 0 : i64, tpu.core_type = #tpu.core_type<tc>} {
    %c0 = arith.constant 0 : index
    %c0_0 = arith.constant 0 : index
    %0 = vector.load %arg3[%c0, %c0_0] : memref<8x128xf32, #tpu.memory_space<vmem>>, vector<8x128xf32>
    %c0_1 = arith.constant 0 : index
    %1 = memref.load %arg0[%c0_1] : memref<1xi32, #tpu.memory_space<smem>>
    %c0_i32 = arith.constant 0 : i32
    %2 = arith.subi %1, %c0_i32 : i32
    %3 = arith.addi %c0_i32, %2 : i32
    %c1_i32 = arith.constant 1 : i32
    %4 = scf.for %arg6 = %c0_i32 to %3 step %c1_i32 iter_args(%arg7 = %0) -> (vector<8x128xf32>)  : i32 {
      %37 = arith.index_cast %arg6 : i32 to index
      %c0_15 = arith.constant 0 : index
      %c0_16 = arith.constant 0 : index
      %38 = vector.load %arg2[%37, %c0_15, %c0_16] : memref<16x8x128xf32, #tpu.memory_space<vmem>>, vector<1x8x128xf32>
      %39 = vector.shape_cast %38 : vector<1x8x128xf32> to vector<8x128xf32>
      %40 = arith.index_cast %arg6 : i32 to index
      %c0_17 = arith.constant 0 : index
      %c0_18 = arith.constant 0 : index
      %41 = vector.load %arg1[%40, %c0_17, %c0_18] : memref<16x8x1xf32, #tpu.memory_space<vmem>>, vector<1x8x1xf32>
      %42 = vector.shape_cast %41 : vector<1x8x1xf32> to vector<8x1xf32>
      %cst_19 = arith.constant 0.949999988 : f32
      %43 = vector.broadcast %cst_19 : f32 to vector<8x128xf32>
      %44 = arith.mulf %arg7, %43 : vector<8x128xf32>
      %45 = arith.addf %44, %39 : vector<8x128xf32>
      %46 = arith.mulf %45, %45 : vector<8x128xf32>
      %cst_20 = arith.constant dense<0.000000e+00> : vector<8xf32>
      %47 = vector.multi_reduction <add>, %46, %cst_20 [1] : vector<8x128xf32> to vector<8xf32>
      %48 = vector.shape_cast %47 : vector<8xf32> to vector<8x1xf32>
      %cst_21 = arith.constant 1.000000e-24 : f32
      %49 = vector.broadcast %cst_21 : f32 to vector<8x1xf32>
      %50 = arith.maximumf %48, %49 : vector<8x1xf32>
      %51 = math.rsqrt %50 : vector<8x1xf32>
      %cst_22 = arith.constant 0.000000e+00 : f32
      %52 = vector.broadcast %cst_22 : f32 to vector<8x1xf32>
      %53 = arith.cmpf ogt, %42, %52 : vector<8x1xf32>
      %54 = vector.broadcast %51 : vector<8x1xf32> to vector<8x128xf32>
      %55 = arith.mulf %45, %54 : vector<8x128xf32>
      %56 = vector.shape_cast %53 : vector<8x1xi1> to vector<8x1xi1>
      %57 = vector.broadcast %56 : vector<8x1xi1> to vector<8x128xi1>
      %58 = arith.select %57, %55, %arg7 : vector<8x128xi1>, vector<8x128xf32>
      scf.yield %58 : vector<8x128xf32>
    }
    %c0_2 = arith.constant 0 : index
    %c0_3 = arith.constant 0 : index
    %5 = vector.load %arg5[%c0_2, %c0_3] : memref<8x128xf32, #tpu.memory_space<vmem>>, vector<8x128xf32>
    tpu.vector_store %arg5[%c0_2, %c0_3], %4 {strides = array<i32>} : memref<8x128xf32, #tpu.memory_space<vmem>>, vector<8x128xf32>,
    %cst = arith.constant dense<0.000000e+00> : vector<8x8xf32>
    %6 = tpu.matmul %4, %4, %cst {dimension_numbers = #tpu.dot_dimension_numbers<[1], [1], [0], [0], [0, 0, 1, 0], [], []>} : vector<8x128xf32>, vector<8x128xf32>, vector<8x8xf32> -> vector<8x8xf32>
    %cst_4 = arith.constant 1.000000e+01 : f32
    %7 = vector.broadcast %cst_4 : f32 to vector<8x8xf32>
    %8 = arith.mulf %6, %7 : vector<8x8xf32>
    %9 = tpu.iota {dimensions = array<i32: 0>} : vector<8x8xi32>
    %10 = tpu.iota {dimensions = array<i32: 1>} : vector<8x8xi32>
    %11 = arith.cmpi ne, %9, %10 : vector<8x8xi32>
    %12 = math.exp %8 : vector<8x8xf32>
    %cst_5 = arith.constant 0.000000e+00 : f32
    %13 = vector.broadcast %cst_5 : f32 to vector<8x8xf32>
    %14 = arith.select %11, %12, %13 : vector<8x8xi1>, vector<8x8xf32>
    %cst_6 = arith.constant dense<0.000000e+00> : vector<8xf32>
    %15 = vector.multi_reduction <add>, %14, %cst_6 [1] : vector<8x8xf32> to vector<8xf32>
    %16 = vector.shape_cast %15 : vector<8xf32> to vector<8x1xf32>
    %cst_7 = arith.constant 0.142857149 : f32
    %17 = vector.broadcast %cst_7 : f32 to vector<8x1xf32>
    %18 = arith.mulf %16, %17 : vector<8x1xf32>
    %19 = math.log %18 : vector<8x1xf32>
    %20 = arith.cmpf one, %19, %19 : vector<8x1xf32>
    %cst_8 = arith.constant dense<true> : vector<8x1xi1>
    %21 = arith.xori %20, %cst_8 : vector<8x1xi1>
    %22 = arith.extui %21 : vector<8x1xi1> to vector<8x1xi32>
    %23 = arith.sitofp %22 : vector<8x1xi32> to vector<8x1xf32>
    %24 = vector.shape_cast %23 : vector<8x1xf32> to vector<1x8x1xf32>
    %cst_9 = arith.constant dense<0.000000e+00> : vector<1xf32>
    %25 = vector.multi_reduction <add>, %24, %cst_9 [1, 2] : vector<1x8x1xf32> to vector<1xf32>
    %26 = vector.shape_cast %25 : vector<1xf32> to vector<1x1x1xf32>
    %27 = vector.extract %26[0, 0, 0] : f32 from vector<1x1x1xf32>
    %cst_10 = arith.constant 0.000000e+00 : f32
    %28 = vector.broadcast %cst_10 : f32 to vector<8x1xf32>
    %29 = arith.select %21, %19, %28 : vector<8x1xi1>, vector<8x1xf32>
    %30 = vector.shape_cast %29 : vector<8x1xf32> to vector<1x8x1xf32>
    %cst_11 = arith.constant dense<0.000000e+00> : vector<1xf32>
    %31 = vector.multi_reduction <add>, %30, %cst_11 [1, 2] : vector<1x8x1xf32> to vector<1xf32>
    %32 = vector.shape_cast %31 : vector<1xf32> to vector<1x1x1xf32>
    %33 = vector.extract %32[0, 0, 0] : f32 from vector<1x1x1xf32>
    %34 = arith.divf %33, %27 : f32
    %cst_12 = arith.constant 1.000000e+00 : f32
    %35 = arith.mulf %cst_12, %34 : f32
    %c0_13 = arith.constant 0 : index
    %c0_14 = arith.constant 0 : index
    %36 = memref.load %arg4[%c0_13, %c0_14] : memref<1x1xf32, #tpu.memory_space<smem>>
    memref.store %35, %arg4[%c0_13, %c0_14] : memref<1x1xf32, #tpu.memory_space<smem>>
    return
  }
}

</mosaic_0001>

<bundles_post_ra>
// kernel: disloss.1
= control target key start
LH: loop header
LB: loop body
LE: loop exit
PB: predicated region body
PF: predicated region fallthrough
CT: control target
= control target key end

     0   :  { %12 = vsyncpa [#allocation4], 0  ;;  %s320_s0 = inlined_call_operand.<no memory space> [shape: s32[1], index: 0, kind: input, shape index: {}]   ;;  %s321_s1 = inlined_call_operand.vmem [shape: f32[16,8,1], index: 1, kind: input, shape index: {}]   ;;  %s322_s2 = inlined_call_operand.vmem [shape: f32[16,8,128], index: 2, kind: input, shape index: {}]   ;;  %s323_s3 = inlined_call_operand.vmem [shape: f32[8,128], index: 3, kind: input, shape index: {}, may-alias: {3,5}]   ;;  %s324_s4 = inlined_call_operand.hbm [shape: f32[1,1], index: 4, kind: output, shape index: {0}]   ;;  %s325_s5 = inlined_call_operand.vmem [shape: f32[8,128], index: 5, kind: output, shape index: {1}, may-alias: {3,5}]  }
   0x1   :  { %v21_v0 = vld [vmem:[%s323_s3] sm:$0xff]   ;;  %p172_p0 = scmp.le.s32.totalorder %s320_s0, 0 }
   0x2   :  { %v252_v1 = vmov %v21_v0   ;;  %s296_s22 = smov (!%p172_p0), 0  }
   0x3   :  { %167 = sbr.rel (%p172_p0) target bundleno = 156 (0x9c), region = 48 }
   0x8   :  { %v244_v2 = vmov %v21_v0  }
   0x9 LB: > { %v256_v3 = vmov 0   ;;  %s173_s23 = sshll.u32 %s250_s22, 3  ;;  %v35_v4 = vmul.f32 0.95, %v246_v2  ;;  %s26_s22 = sadd.s32 1, %s250_s22   ;;  %s250_s22 = sphi %s296_s22, %s26_s22   ;;  %v246_v2 = vphi %v244_v2, %v245_v2  }
   0xa   : > { %209 = vset.pattern.permute.xlu0 %v256_v3  ;;  %s31_s25 = scalar_lea.vmem %s322_s2, %s173_s23  ;;  %s33_s28 = scalar_lea.vmem %s321_s1, %s173_s23 }
   0xb   : > { %v32_v5 = vld [vmem:[%s31_s25] sm:$0xff]  ;;  %p25_p1 = scmp.ge.s32.totalorder %s26_s22, %s320_s0 }
   0xc   : > { %v36_v6 = vadd.f32 %v35_v4, %v32_v5  ;;  %v34_v8 = vld [vmem:[%s33_s28] sm:$0xff] }
   0xd   : > { %vm51_vm0 = vcmp.gt.f32.partialorder %v34_v8, 0.0 }
   0xe   : > { %v37_v7 = vmul.f32 %v36_v6, %v36_v6  ;;  %v53_v9 = vsel %vm51_vm0, 1, %v256_v3 }
  0x10   : > { %38 = vadd.xlane.f32.xlu0 %v37_v7 }
  0x24   : > { %55 = vperm.xlu0 %209, %v53_v9  }
  0x83   : > { %v39_v10 = vpop.xlane.xlu0 %38 }
  0x84   : > { %v40_v11 = vmax.f32 %v39_v10, 1e-24 }
  0x86   : > { %210 = vrsqrt.f32 %v40_v11  ;;  %vm47_vm2 = vweird.f32 %v40_v11 }
  0x8c   : > { %v211_v12 = vpop.eup %210 }
  0x8d   : > { %v42_v13 = vmul.f32 %v211_v12, %v40_v11  ;;  %vm48_vm1 = vweird.f32 %v211_v12 }
  0x8e   : > { %vm49_vm3 = vmor %vm47_vm2, %vm48_vm1 }
  0x8f   : > { %v43_v14 = vmul.f32 %v211_v12, %v42_v13 }
  0x91   : > { %v44_v15 = vmul.f32 0.5, %v43_v14 }
  0x93   : > { %v45_v16 = vsub.f32 1.5, %v44_v15 }
  0x95   : > { %v46_v17 = vmul.f32 %v211_v12, %v45_v16 }
  0x96   : > { %v56_v18 = vpop.permute.xlu0 %55 }
  0x97   : > { %v50_v19 = vsel %vm49_vm3, %v211_v12, %v46_v17  ;;  %vm57_vm4 = vcmp.eq.s32.totalorder %v56_v18, 1  ;;  %28 = sbr.rel (!%p25_p1) target bundleno = 9 (0x9), region = 54 }
  0x98   : > { %v52_v20 = vmul.f32 %v50_v19, %v36_v6 }
  0x9a   : > { %v58_v21 = vsel %vm57_vm4, %v52_v20, %v246_v2  }
  0x9b   : > { %v245_v2 = vmov %v58_v21   ;;  %v253_v1 = vmov (%p25_p1), %v58_v21  }
  0x9c PF:  { %59 = vst [vmem:[%s325_s5] sm:$0xff] %v254_v1  ;;  %75 = vmatpush.xpose.msra.mxu0 %v254_v1  ;;  %v81_v24 = vlaneseq  ;;  %vm89_vm6 = vcmask 64512   ;;  %vm100_vm8 = vcmask 7168   ;;  %vm257_vm9 = vmmov 1   ;;  %s146_s5 = sshll.u32 %s324_s4, 4  ;;  %s259_s11 = smov [#allocation3]   ;;  %v254_v1 = vphi %v252_v1, %v253_v1   ;;  %s147_s5 = int_to_ptr.hbm [resolvable:$true] %s146_s5 }
  0x9d   :  { %v258_v36 = vmov 0.0  }
  0x9e   :  { %v82_v26 = vshrl.u32 %v81_v24, 7  ;;  %v84_v27 = vand.u32 127, %v81_v24 }
  0x9f   :  { %76 = vmatmul.f32.vlgmr.msra.gmra.mxu0 %v254_v1 }
  0xa0   :  { %vm85_vm5 = vcmp.ne.s32.totalorder %v82_v26, %v84_v27 }
 0x11c   :  { %v77_v22 = vpop.f32.mrf.mxu0 }
 0x11d   :  { %v80_v23 = vmul.f32 10.0, %v77_v22 }
 0x11f   :  { %v86_v25 = vmul.f32 1.442695, %v80_v23 }
 0x121   :  { %212 = vpow2.f32 %v86_v25 }
 0x127   :  { %v213_v28 = vpop.eup %212 }
 0x128   :  { %v88_v29 = vsel %vm85_vm5, %v213_v28, 0.0 }
 0x129   :  { %v90_v30 = vsel %vm89_vm6, %v88_v29, 0.0 }
 0x12a   :  { %91 = vadd.xlane.f32.xlu0 %v90_v30 }
 0x19d   :  { %v92_v31 = vpop.xlane.xlu0 %91 }
 0x19e   :  { %v93_v32 = vmul.f32 0.14285715, %v92_v31 }
 0x1a0   :  { %214 = vlog2.f32 %v93_v32 }
 0x1a6   :  { %v215_v33 = vpop.eup %214 }
 0x1a7   :  { %v95_v34 = vmul.f32 0.6931472, %v215_v33 }
 0x1a9   :  { %vm96_vm7 = vcmp.ne.f32.partialorder %v95_v34, %v95_v34 }
 0x1aa   :  { %vm97_vm10 = vmxor %vm96_vm7, %vm257_vm9 }
 0x1ab   :  { %v111_v35 = vsel %vm97_vm10, %v95_v34, 0.0  ;;  %v174_v37 = vsel %vm97_vm10, 1.0, %v258_v36 }
 0x1ac   :  { %v112_v38 = vsel %vm100_vm8, %v111_v35, 0.0  ;;  %v101_v39 = vsel %vm100_vm8, %v174_v37, 0.0 }
 0x1ad   :  { %113 = vadd.xlane.f32.xlu1 %v112_v38  ;;  %102 = vadd.xlane.f32.xlu0 %v101_v39 }
 0x220   :  { %v114_v40 = vpop.xlane.xlu1 %113  ;;  %v103_v41 = vpop.xlane.xlu0 %102 }
 0x221   :  { %v115_v42 = vrot.slane %v114_v40, 4  ;;  %v104_v43 = vrot.slane %v103_v41, 4 }
 0x223   :  { %v116_v44 = vadd.f32 %v115_v42, %v114_v40  ;;  %v105_v45 = vadd.f32 %v104_v43, %v103_v41 }
 0x225   :  { %v117_v46 = vrot.slane %v116_v44, 2  ;;  %v106_v47 = vrot.slane %v105_v45, 2 }
 0x227   :  { %v118_v48 = vadd.f32 %v117_v46, %v116_v44  ;;  %v107_v49 = vadd.f32 %v106_v47, %v105_v45 }
 0x229   :  { %v108_v50 = vrot.slane %v107_v49, 1  ;;  %v119_v51 = vrot.slane %v118_v48, 1 }
 0x22b   :  { %v109_v52 = vadd.f32 %v108_v50, %v107_v49  ;;  %v120_v53 = vadd.f32 %v119_v51, %v118_v48 }
 0x22d   :  { %175 = vpush %v109_v52 }
 0x22e   :  { %177 = vpush %v120_v53 }
 0x25e   :  { %s176_s0 = spop %175 }
 0x25f   :  { %v122_v54 = vstv %s176_s0  ;;  %s178_s8 = spop %177 }
 0x260   :  { %216 = vrcp.f32 %v122_v54  ;;  %v134_v58 = vand.u32 2147483648, %v122_v54  ;;  %v132_v60 = vand.u32 2147483647, %v122_v54  ;;  %vm128_vm12 = vweird.f32 %v122_v54 }
 0x262   :  { %v135_v62 = vor.u32 1.1754944e-38, %v134_v58  ;;  %vm133_vm14 = vcmp.eq.f32.partialorder %v132_v60, 8.507059e+37 }
 0x266   :  { %v217_v55 = vpop.eup %216 }
 0x267   :  { %v124_v56 = vmul.f32 %v217_v55, %v122_v54  ;;  %vm129_vm11 = vweird.f32 %v217_v55 }
 0x268   :  { %vm130_vm13 = vmor %vm128_vm12, %vm129_vm11 }
 0x269   :  { %v125_v57 = vsub.f32 1.0, %v124_v56 }
 0x26b   :  { %v126_v59 = vmul.f32 %v217_v55, %v125_v57 }
 0x26d   :  { %v127_v61 = vadd.f32 %v217_v55, %v126_v59 }
 0x26f   :  { %v131_v63 = vsel %vm130_vm13, %v217_v55, %v127_v61 }
 0x270   :  { %v136_v0 = vsel %vm133_vm14, %v135_v62, %v131_v63 }
 0x271   :  { %179 = vpush %v136_v0 }
 0x2a2   :  { %s180_s9 = spop %179 }
 0x2a3   :  { %s138_s10 = smul.f32 %s180_s9, %s178_s8 }
 0x2a5   :  { %140 = sst [smem:[#allocation3]] %s138_s10 }
 0x2a6   :  { %149 = dma.smem_to_hbm %s259_s11, 16, %s147_s5, [#allocation4]  }
 0x2a7   :  { %242 = dma.done.wait [#allocation4], 16  }
 0x2a8   :  { %243 = vsyncadd [#allocation4], 4294967280 }
 0x2a9   :  { %158 = sfence }
 0x2aa   :  { %159 = vsyncpa [#allocation4], 1 }

</bundles_post_ra>
